<compile_context>
chip_gen: v5e
topology: v5e:2x2
jax: 0.10.0
libtpu: 0.0.40
codegen_flags: <defaults>
</compile_context>

<pallas_src>
import jax
import jax.numpy as jnp
from jax.experimental import pallas as pl
from jax.experimental.pallas import tpu as pltpu


def _round_up(x: int, m: int) -> int:
    return ((x + m - 1) // m) * m


_WEIGHT_TILE_BUDGET = 8 * 1024 * 1024   # ~8 MiB weight tile -> 16 MiB double-buffered
_VMEM_LIMIT = 48 * 1024 * 1024          # safe on v7x (64 MiB/TC), ample on v5e/v6e


def _gemv_full_k_kernel(x_ref, wt_ref, b_ref, o_ref):
    # Whole reduction dimension resident: single MXU pass, bias added inline.
    o_ref[...] = (
        jnp.dot(x_ref[...], wt_ref[...], preferred_element_type=jnp.float32)
        + b_ref[...]
    ).astype(o_ref.dtype)


def _make_gemv_tiled_k_kernel(tile_i):
    # Used only when I is too large for a single ~8 MiB weight tile.
    def kernel(x_ref, wt_ref, b_ref, o_ref, acc_ref):
        k = pl.program_id(1)

        @pl.when(k == 0)
        def _():
            acc_ref[...] = jnp.zeros_like(acc_ref)

        start = pl.multiple_of(k * tile_i, tile_i)
        acc_ref[...] += jnp.dot(
            x_ref[:, pl.ds(start, tile_i)],
            wt_ref[...],
            preferred_element_type=jnp.float32,
        )

        @pl.when(k == pl.num_programs(1) - 1)
        def _():
            o_ref[...] = (acc_ref[...] + b_ref[...]).astype(o_ref.dtype)

    return kernel


class PallasLinear:
    """y = W @ x + b with W: (O, I), b: (O,), x: (I,). Matches torch MyLinear."""

    def __init__(self, weight, bias, stream_dtype=None):
        out_f, in_f = weight.shape
        self.in_features = int(in_f)
        self.out_features = int(out_f)
        self._param_dtype = jnp.result_type(weight.dtype, bias.dtype)

        w_dt = jnp.dtype(stream_dtype) if stream_dtype is not None else weight.dtype
        itemsize = jnp.dtype(w_dt).itemsize

        in_128 = _round_up(self.in_features, 128)
        out_128 = _round_up(self.out_features, 128)

        # Output tile: lane-aligned, <= 1024, and split so n_o >= 2 when O allows,
        # letting the "parallel" O axis shard across both v7x TensorCores.
        tile_o = min(1024, out_128)
        if out_128 >= 2 * 128 and out_128 // tile_o < 2:
            tile_o = _round_up((out_128 + 1) // 2, 128)
        out_p = _round_up(out_128, tile_o)

        # Reduction tile: as large as the ~8 MiB weight-tile budget allows.
        tile_i_max = max(128, (_WEIGHT_TILE_BUDGET // (tile_o * itemsize)) // 128 * 128)
        tile_i = min(tile_i_max, in_128)
        in_p = _round_up(in_128, tile_i)

        self._tile_i, self._tile_o = tile_i, tile_o
        self._in_p, self._out_p = in_p, out_p
        self._n_i, self._n_o = in_p // tile_i, out_p // tile_o

        # One-time layout plumbing: pad + transpose W to lane-dense (I_p, O_p),
        # pad bias to (1, O_p).  Cached; never redone in the per-call hot path.
        wt = jnp.zeros((in_p, out_p), dtype=w_dt)
        wt = wt.at[: self.in_features, : self.out_features].set(weight.T.astype(w_dt))
        b2 = jnp.zeros((1, out_p), dtype=bias.dtype)
        b2 = b2.at[0, : self.out_features].set(bias)
        self._wt = jax.block_until_ready(wt)
        self._b2 = jax.block_until_ready(b2)

        # Jit the whole forward so x-pad / output-slice fuse with the pallas_call.
        self._apply = jax.jit(self._forward)

    def _forward(self, wt, b2, x):
        in_f, out_f = self.in_features, self.out_features
        in_p, out_p = self._in_p, self._out_p
        tile_i, tile_o = self._tile_i, self._tile_o
        n_i, n_o = self._n_i, self._n_o
        out_dtype = jnp.result_type(self._param_dtype, x.dtype)

        # x is tiny (I * 4 bytes): pad once, keep fully VMEM-resident.
        x2 = jnp.zeros((1, in_p), dtype=x.dtype).at[0, :in_f].set(x)

        if n_i == 1:
            # No reduction grid axis: one weight block per output tile.
            out = pl.pallas_call(
                _gemv_full_k_kernel,
                out_shape=jax.ShapeDtypeStruct((1, out_p), out_dtype),
                grid_spec=pltpu.PrefetchScalarGridSpec(
                    num_scalar_prefetch=0,
                    grid=(n_o,),
                    in_specs=[
                        pl.BlockSpec((1, in_p), lambda j: (0, 0)),        # x (resident)
                        pl.BlockSpec((in_p, tile_o), lambda j: (0, j)),   # W^T
                        pl.BlockSpec((1, tile_o), lambda j: (0, j)),      # bias
                    ],
                    out_specs=pl.BlockSpec((1, tile_o), lambda j: (0, j)),
                ),
                compiler_params=pltpu.CompilerParams(
                    dimension_semantics=("parallel",),
                    vmem_limit_bytes=_VMEM_LIMIT,
                ),
            )(x2, wt, b2)
        else:
            out = pl.pallas_call(
                _make_gemv_tiled_k_kernel(tile_i),
                out_shape=jax.ShapeDtypeStruct((1, out_p), out_dtype),
                grid_spec=pltpu.PrefetchScalarGridSpec(
                    num_scalar_prefetch=0,
                    grid=(n_o, n_i),
                    in_specs=[
                        pl.BlockSpec((1, in_p), lambda j, k: (0, 0)),        # x (resident)
                        pl.BlockSpec((tile_i, tile_o), lambda j, k: (k, j)), # W^T
                        pl.BlockSpec((1, tile_o), lambda j, k: (0, j)),      # bias
                    ],
                    out_specs=pl.BlockSpec((1, tile_o), lambda j, k: (0, j)),
                    scratch_shapes=[pltpu.VMEM((1, tile_o), jnp.float32)],
                ),
                compiler_params=pltpu.CompilerParams(
                    dimension_semantics=("parallel", "arbitrary"),
                    vmem_limit_bytes=_VMEM_LIMIT,
                ),
            )(x2, wt, b2)

        return out[0, :out_f]

    def __call__(self, x):
        return self._apply(self._wt, self._b2, x)


def my_linear(weight, bias, x):
    """One-off convenience wrapper (prefer constructing PallasLinear once)."""
    return PallasLinear(weight, bias)(x)


if __name__ == "__main__":
    key = jax.random.PRNGKey(0)

    # Case 1: module's demo-sized shapes (in=32, out=16).
    in_features, out_features = 32, 16
    kw, kb, kx = jax.random.split(key, 3)
    weight = jax.random.normal(kw, (out_features, in_features), dtype=jnp.float32)
    bias = jax.random.normal(kb, (out_features,), dtype=jnp.float32)
    x = jax.random.normal(kx, (in_features,), dtype=jnp.float32)

    layer = PallasLinear(weight, bias)          # layout plumbing done once, here
    y = layer(x)
    jax.block_until_ready(y)
    y_ref = weight @ x + bias
    assert y.shape == (out_features,)
    assert jnp.allclose(y, y_ref, atol=1e-4, rtol=1e-5)

    # Case 2: non-128-aligned shapes + multiple output tiles (exercises padding path).
    in_features2, out_features2 = 300, 200
    kw2, kb2, kx2 = jax.random.split(jax.random.PRNGKey(1), 3)
    weight2 = jax.random.normal(kw2, (out_features2, in_features2), dtype=jnp.float32)
    bias2 = jax.random.normal(kb2, (out_features2,), dtype=jnp.float32)
    x2 = jax.random.normal(kx2, (in_features2,), dtype=jnp.float32)

    layer2 = PallasLinear(weight2, bias2)
    y2 = layer2(x2)
    jax.block_until_ready(y2)
    y2_ref = weight2 @ x2 + bias2
    assert y2.shape == (out_features2,)
    assert jnp.allclose(y2, y2_ref, atol=1e-4, rtol=1e-5)

    print("KERNEL_OK")
</pallas_src>

<mosaic_0001>
module attributes {stable_mosaic.version = 11 : i64} {
  func.func @_gemv_full_k_kernel(%arg0: i32, %arg1: memref<1x128xf32, #tpu.memory_space<vmem>>, %arg2: memref<128x128xf32, #tpu.memory_space<vmem>>, %arg3: memref<1x128xf32, #tpu.memory_space<vmem>>, %arg4: memref<1x128xf32, #tpu.memory_space<vmem>>) attributes {dimension_semantics = [#tpu.dimension_semantics<parallel>], iteration_bounds = array<i64: 1>, scalar_prefetch = 0 : i64, scratch_operands = 0 : i64, tpu.core_type = #tpu.core_type<tc>, window_params = [{pipeline_mode = #tpu.pipeline_mode<synchronous>, transform_indices = @transform_0, window_bounds = array<i64: 1, 128>}, {transform_indices = @transform_1, window_bounds = array<i64: 128, 128>}, {transform_indices = @transform_2, window_bounds = array<i64: 1, 128>}, {transform_indices = @transform_3, window_bounds = array<i64: 1, 128>}]} {
    %c0 = arith.constant 0 : index
    %c0_0 = arith.constant 0 : index
    %0 = vector.load %arg1[%c0, %c0_0] : memref<1x128xf32, #tpu.memory_space<vmem>>, vector<1x128xf32>
    %c0_1 = arith.constant 0 : index
    %c0_2 = arith.constant 0 : index
    %1 = vector.load %arg2[%c0_1, %c0_2] : memref<128x128xf32, #tpu.memory_space<vmem>>, vector<128x128xf32>
    %cst = arith.constant dense<0.000000e+00> : vector<1x128xf32>
    %2 = tpu.matmul %0, %1, %cst {dimension_numbers = #tpu.dot_dimension_numbers<[1], [0], [0], [1], [0, 0, 1, 1], [], []>} : vector<1x128xf32>, vector<128x128xf32>, vector<1x128xf32> -> vector<1x128xf32>
    %c0_3 = arith.constant 0 : index
    %c0_4 = arith.constant 0 : index
    %3 = vector.load %arg3[%c0_3, %c0_4] : memref<1x128xf32, #tpu.memory_space<vmem>>, vector<1x128xf32>
    %4 = arith.addf %2, %3 : vector<1x128xf32>
    %c0_5 = arith.constant 0 : index
    %c0_6 = arith.constant 0 : index
    %5 = vector.load %arg4[%c0_5, %c0_6] : memref<1x128xf32, #tpu.memory_space<vmem>>, vector<1x128xf32>
    tpu.vector_store %arg4[%c0_5, %c0_6], %4 {strides = array<i32>} : memref<1x128xf32, #tpu.memory_space<vmem>>, vector<1x128xf32>,
    return
  }
  func.func @transform_0(%arg0: i32) -> (i32, i32) {
    %c0_i32 = arith.constant 0 : i32
    %c0_i32_0 = arith.constant 0 : i32
    %c0_i32_1 = arith.constant 0 : i32
    return %c0_i32, %c0_i32_0 : i32, i32
  }
  func.func @transform_1(%arg0: i32) -> (i32, i32) {
    %c0_i32 = arith.constant 0 : i32
    %c0_i32_0 = arith.constant 0 : i32
    return %c0_i32, %arg0 : i32, i32
  }
  func.func @transform_2(%arg0: i32) -> (i32, i32) {
    %c0_i32 = arith.constant 0 : i32
    %c0_i32_0 = arith.constant 0 : i32
    return %c0_i32, %arg0 : i32, i32
  }
  func.func @transform_3(%arg0: i32) -> (i32, i32) {
    %c0_i32 = arith.constant 0 : i32
    %c0_i32_0 = arith.constant 0 : i32
    return %c0_i32, %arg0 : i32, i32
  }
}

</mosaic_0001>

<bundles_post_ra>
// kernel: _forward.1
= control target key start
LH: loop header
LB: loop body
LE: loop exit
PB: predicated region body
PF: predicated region fallthrough
CT: control target
= control target key end

     0   :  { %8 = vsyncpa [#allocation3], 0  ;;  %s103_s15 = smov [#allocation2]   ;;  %s104_s17 = smov 128   ;;  %s138_s0 = inlined_call_operand.vmem [shape: f32[1,128], index: 0, kind: input, shape index: {}]   ;;  %s139_s1 = inlined_call_operand.hbm [shape: f32[128,128], index: 1, kind: input, shape index: {}]   ;;  %s140_s2 = inlined_call_operand.vmem [shape: f32[1,128], index: 2, kind: input, shape index: {}]   ;;  %s141_s3 = inlined_call_operand.vmem [shape: f32[1,128], index: 3, kind: output, shape index: {}]  }
   0x1   :  { %s15_s14 = sshll.u32 %s139_s1, 4  ;;  %s17_s16 = sshll.u32 %s103_s15, 4  ;;  %s16_s14 = int_to_ptr.hbm [resolvable:$true] %s15_s14  ;;  %s18_s16 = int_to_ptr.vmem [resolvable:$true] %s17_s16 }
   0x2   :  { %s105_s18 = smov 8  }
   0x3   :  { %23 = dma.hbm_to_vmem [thread:$0]  %s16_s14, 2048, %s18_s16, [#allocation3], %s104_s17, %s104_s17, %s105_s18  }
   0x4   :  { %101 = dma.done.wait [#allocation3], 2048  }
   0x5   :  { %102 = vsyncadd [#allocation3], 4294965248  ;;  %v46_v0 = vld [vmem:[#allocation2 + $0x78] sm:$0xff]  ;;  %v45_v1 = vld [vmem:[#allocation2 + $0x70] sm:$0xff] }
   0x6   :  { %48 = vmatpush.msra.mxu0 %v46_v0  ;;  %v44_v2 = vld [vmem:[#allocation2 + $0x68] sm:$0xff]  ;;  %v43_v3 = vld [vmem:[#allocation2 + $0x60] sm:$0xff]  ;;  %v42_v4 = vld [vmem:[#allocation2 + $0x58] sm:$0xff] }
   0x7   :  { %v41_v5 = vld [vmem:[#allocation2 + $0x50] sm:$0xff]  ;;  %v40_v6 = vld [vmem:[#allocation2 + $0x48] sm:$0xff]  ;;  %v39_v7 = vld [vmem:[#allocation2 + $0x40] sm:$0xff] }
   0x8   :  { %49 = vmatpush.msra.mxu0 %v45_v1  ;;  %v38_v8 = vld [vmem:[#allocation2 + $0x38] sm:$0xff]  ;;  %v37_v9 = vld [vmem:[#allocation2 + $0x30] sm:$0xff]  ;;  %v36_v10 = vld [vmem:[#allocation2 + $0x28] sm:$0xff] }
   0x9   :  { %v35_v11 = vld [vmem:[#allocation2 + $0x20] sm:$0xff]  ;;  %v34_v12 = vld [vmem:[#allocation2 + $0x18] sm:$0xff]  ;;  %v33_v13 = vld [vmem:[#allocation2 + $0x10] sm:$0xff] }
   0xa   :  { %50 = vmatpush.msra.mxu0 %v44_v2  ;;  %v32_v14 = vld [vmem:[#allocation2 + $0x8] sm:$0xff]  ;;  %v31_v15 = vld [vmem:[#allocation2] sm:$0xff] }
   0xb   :  { %v30_v16 = vld [vmem:[%s138_s0] sm:$0x1] }
   0xc   :  { %51 = vmatpush.msra.mxu0 %v43_v3  ;;  %v47_v17 = vld [vmem:[%s140_s2] sm:$0x1] }
   0xe   :  { %52 = vmatpush.msra.mxu0 %v42_v4 }
  0x10   :  { %53 = vmatpush.msra.mxu0 %v41_v5 }
  0x12   :  { %54 = vmatpush.msra.mxu0 %v40_v6 }
  0x14   :  { %55 = vmatpush.msra.mxu0 %v39_v7 }
  0x16   :  { %56 = vmatpush.msra.mxu0 %v38_v8 }
  0x18   :  { %57 = vmatpush.msra.mxu0 %v37_v9 }
  0x1a   :  { %58 = vmatpush.msra.mxu0 %v36_v10 }
  0x1c   :  { %59 = vmatpush.msra.mxu0 %v35_v11 }
  0x1e   :  { %60 = vmatpush.msra.mxu0 %v34_v12 }
  0x20   :  { %61 = vmatpush.msra.mxu0 %v33_v13 }
  0x22   :  { %62 = vmatpush.msra.mxu0 %v32_v14 }
  0x24   :  { %63 = vmatpush.msra.mxu0 %v31_v15 }
  0x25   :  { %64 = vmatmul.f32.vlgmr.msra.gmra.mxu0 %v30_v16 }
  0xa2   :  { %v65_v18 = vpop.f32.mrf.mxu0 }
  0xa3   :  { %v66_v19 = vadd.f32 %v65_v18, %v47_v17 }
  0xa5   :  { %68 = vst [vmem:[%s141_s3] sm:$0x1] %v66_v19 }
  0xa6   :  { %73 = vsyncpa [#allocation3], 1 }

</bundles_post_ra>
